<compile_context>
chip_gen: v5e
topology: v5e:2x2
jax: 0.10.0
libtpu: 0.0.40
codegen_flags: <defaults>
</compile_context>

<pallas_src>
import jax
import jax.numpy as jnp
from jax.experimental import pallas as pl
from jax.experimental.pallas import tpu as pltpu

PACK = 4  # original rows packed per lane-row (4 * hidden_dim(32) = 128 lanes)


# ----------------------------- helpers --------------------------------------
def _round_up(x, m):
    return ((x + m - 1) // m) * m


def _pick_bn(n_rows, block_rows):
    """Row-block size (in packed rows).  Blocks are either the full (small)
    array or a multiple of 8; ragged final blocks are masked by Pallas."""
    if n_rows <= 8:
        return n_rows                       # single block == whole array
    if n_rows <= block_rows:
        # split into (at least) two tiles so a v7x megacore can shard the axis
        return min(_round_up(pl.cdiv(n_rows, 2), 8), _round_up(n_rows, 8))
    return block_rows


def _pad_rows(a, multiple):
    pad = (-a.shape[0]) % multiple
    if pad:
        return jnp.pad(a, ((0, pad), (0, 0)))
    return a


def _block_diag4(w):
    """(k, h) -> (PACK*k, PACK*h) with w repeated along the diagonal."""
    k, h = w.shape
    out = jnp.zeros((PACK * k, PACK * h), w.dtype)
    for g in range(PACK):
        out = out.at[g * k:(g + 1) * k, g * h:(g + 1) * h].set(w)
    return out


# ----------------------------- node kernel ----------------------------------
# packed: out4 = h4 @ Wh4 + lap4 @ (sign-folded Wl4) + b4     (all lane-dense)
def _node_kernel(h4_ref, lap4_ref, wh_ref, wl_ref, b_ref, out_ref):
    acc = jnp.dot(h4_ref[...], wh_ref[...], preferred_element_type=jnp.float32)
    acc = acc + jnp.dot(lap4_ref[...], wl_ref[...],
                        preferred_element_type=jnp.float32)
    out_ref[...] = (acc + b_ref[...]).astype(out_ref.dtype)


def node_embed(h4, lap4, wh4, wl4, b4, *, block_rows=1024,
               out_dtype=jnp.float32):
    n4, dh4 = h4.shape
    dl4 = lap4.shape[1]
    hw = b4.shape[1]                       # PACK * hidden_dim (128 for H = 32)
    bn = _pick_bn(n4, block_rows)
    return pl.pallas_call(
        _node_kernel,
        out_shape=jax.ShapeDtypeStruct((n4, hw), out_dtype),
        grid=(pl.cdiv(n4, bn),),
        in_specs=[
            pl.BlockSpec((bn, dh4), lambda i: (i, 0)),
            pl.BlockSpec((bn, dl4), lambda i: (i, 0)),
            pl.BlockSpec((dh4, hw), lambda i: (0, 0)),
            pl.BlockSpec((dl4, hw), lambda i: (0, 0)),
            pl.BlockSpec((1, hw), lambda i: (0, 0)),
        ],
        out_specs=pl.BlockSpec((bn, hw), lambda i: (i, 0)),
        compiler_params=pltpu.CompilerParams(dimension_semantics=("parallel",)),
    )(h4, lap4, wh4, wl4, b4)


# ----------------------------- edge kernel ----------------------------------
# ef  = exp(-(ed - mu)^2 / dev)                 (Gaussian RBF on distance)
# out4 = et4@Wt4 + es4@Ws4 + eb4@Wb4 + ef4@Wf4 + b4   (folded linear chain,
#        ef term fed through the MXU as 4 extra contraction columns)
def _edge_kernel(et_ref, es_ref, eb_ref, ed_ref,
                 wt_ref, ws_ref, wb_ref, wf_ref, b_ref,
                 mu_ref, dev_ref, out_ref):
    mu = mu_ref[0]
    dev = dev_ref[0]                       # no clamp: mirrors the PyTorch module
    d = ed_ref[...] - mu                   # (bn, PACK)
    ef = jnp.exp(-(d * d) / dev)           # (bn, PACK)
    acc = jnp.dot(et_ref[...], wt_ref[...], preferred_element_type=jnp.float32)
    acc = acc + jnp.dot(es_ref[...], ws_ref[...],
                        preferred_element_type=jnp.float32)
    acc = acc + jnp.dot(eb_ref[...], wb_ref[...],
                        preferred_element_type=jnp.float32)
    acc = acc + jnp.dot(ef, wf_ref[...], preferred_element_type=jnp.float32)
    out_ref[...] = (acc + b_ref[...]).astype(out_ref.dtype)


def edge_embed(et4, es4, eb4, ed4, wt4, ws4, wb4, wf4, b4, mu, dev,
               *, block_rows=1024, out_dtype=jnp.float32):
    n4 = et4.shape[0]
    dt4, ds4 = et4.shape[1], es4.shape[1]
    db4, dd4 = eb4.shape[1], ed4.shape[1]
    hw = b4.shape[1]
    bn = _pick_bn(n4, block_rows)
    return pl.pallas_call(
        _edge_kernel,
        out_shape=jax.ShapeDtypeStruct((n4, hw), out_dtype),
        grid=(pl.cdiv(n4, bn),),
        in_specs=[
            pl.BlockSpec((bn, dt4), lambda i: (i, 0)),
            pl.BlockSpec((bn, ds4), lambda i: (i, 0)),
            pl.BlockSpec((bn, db4), lambda i: (i, 0)),
            pl.BlockSpec((bn, dd4), lambda i: (i, 0)),
            pl.BlockSpec((dt4, hw), lambda i: (0, 0)),
            pl.BlockSpec((ds4, hw), lambda i: (0, 0)),
            pl.BlockSpec((db4, hw), lambda i: (0, 0)),
            pl.BlockSpec((dd4, hw), lambda i: (0, 0)),
            pl.BlockSpec((1, hw), lambda i: (0, 0)),
            pl.BlockSpec(memory_space=pltpu.MemorySpace.SMEM),
            pl.BlockSpec(memory_space=pltpu.MemorySpace.SMEM),
        ],
        out_specs=pl.BlockSpec((bn, hw), lambda i: (i, 0)),
        compiler_params=pltpu.CompilerParams(dimension_semantics=("parallel",)),
    )(et4, es4, eb4, ed4, wt4, ws4, wb4, wf4, b4, mu, dev)


# ----------------------------- parameters ------------------------------------
def init_params(key, in_dim_node, in_dim_edge, hidden_dim, pos_enc_dim,
                initial_mu=4.0, initial_dev=1.0):
    ks = jax.random.split(key, 10)

    def linear(kw, kb, din, dout):
        bound = 1.0 / jnp.sqrt(din)
        w = jax.random.uniform(kw, (dout, din), jnp.float32, -bound, bound)
        b = jax.random.uniform(kb, (dout,), jnp.float32, -bound, bound)
        return w, b

    p = {}
    p["linear_h"] = linear(ks[0], ks[1], in_dim_node, hidden_dim)
    p["linear_ec"] = linear(ks[2], ks[3], in_dim_edge, hidden_dim)
    p["linear_ef"] = linear(ks[4], ks[5], 1, hidden_dim)
    p["linear_e"] = linear(ks[6], ks[7], 2 * hidden_dim, hidden_dim)
    p["embedding_lap_pos_enc"] = linear(ks[8], ks[9], pos_enc_dim, hidden_dim)
    p["ef_mu"] = jnp.array([initial_mu], jnp.float32)
    p["ef_dev"] = jnp.array([initial_dev], jnp.float32)
    return p


def prepare_params(params, edge_feat_dims):
    """Fold & pack all sign-independent weights once per parameter set
    (hoisted out of the per-forward hot path)."""
    wh, bh = params["linear_h"]
    wl, bl = params["embedding_lap_pos_enc"]
    wec, bec = params["linear_ec"]
    wef, bef = params["linear_ef"]
    we, be_ = params["linear_e"]
    H = wh.shape[0]
    dt, ds, db = edge_feat_dims

    # node path: block-diagonalized weights for 4-row packing
    wh4 = _block_diag4(wh.T)                                    # (4*din, 4*H)
    wl4 = _block_diag4(wl.T)                                    # (4*P,   4*H)
    b_h4 = jnp.tile((bh + bl).reshape(1, -1), (1, PACK))        # (1, 4*H)

    # edge path: fold linear_ec / linear_ef into linear_e (no nonlinearity
    # between them), split per feature group so et/es/eb/ef never need concat.
    we1, we2 = we.T[:H, :], we.T[H:, :]
    w_fold = wec.T @ we1                                        # (in_dim_edge, H)
    wrow = wef.T @ we2                                          # (1, H)
    b_fold = (bec.reshape(1, -1) @ we1 + bef.reshape(1, -1) @ we2
              + be_.reshape(1, -1))                             # (1, H)
    return {
        "hidden_dim": H,
        "pos_enc_dim": wl.shape[1],
        "wh4": wh4,
        "wl4": wl4,
        "b_h4": b_h4,
        "w_et4": _block_diag4(w_fold[:dt]),
        "w_es4": _block_diag4(w_fold[dt:dt + ds]),
        "w_eb4": _block_diag4(w_fold[dt + ds:dt + ds + db]),
        "w_ef4": _block_diag4(wrow),
        "b_e4": jnp.tile(b_fold, (1, PACK)),
        "ef_mu": params["ef_mu"],
        "ef_dev": params["ef_dev"],
    }


# ----------------------------- module forward --------------------------------
def input_embedding_forward(prepared, h, lap_pos_enc, et, es, ed, eb, sign_key,
                            *, block_rows=1024):
    H = prepared["hidden_dim"]
    P = prepared["pos_enc_dim"]
    n = h.shape[0]
    ne = et.shape[0]

    # random sign flip per forward (torch.rand >= 0.5 -> +1.0 else -1.0),
    # folded into the tiny packed lap weight: (x * s) @ W == x @ (diag(s) W)
    r = jax.random.uniform(sign_key, (P,), jnp.float32)
    sign = jnp.where(r >= 0.5, 1.0, -1.0).astype(jnp.float32)
    wl4 = jnp.tile(sign, PACK)[:, None] * prepared["wl4"]

    # ---- node path: lane-dense 4-row packed matmul --------------------------
    h_p = _pad_rows(h.astype(jnp.float32), PACK)
    lap_p = _pad_rows(lap_pos_enc.astype(jnp.float32), PACK)
    n_pad = h_p.shape[0]
    h4 = h_p.reshape(n_pad // PACK, -1)          # free view: (N/4, 4*din)
    lap4 = lap_p.reshape(n_pad // PACK, -1)      # free view: (N/4, 4*P)
    h_out = node_embed(h4, lap4, prepared["wh4"], wl4, prepared["b_h4"],
                       block_rows=block_rows).reshape(n_pad, H)
    if n_pad != n:
        h_out = h_out[:n]
    # nn.Dropout in eval mode == identity
    # TODO(synk): training-mode input-feature dropout not implemented.

    # ---- edge path: folded linear chain, ef via extra MXU columns -----------
    et_p = _pad_rows(et.astype(jnp.float32), PACK)
    es_p = _pad_rows(es.astype(jnp.float32), PACK)
    eb_p = _pad_rows(eb.astype(jnp.float32), PACK)
    ed_p = _pad_rows(ed.astype(jnp.float32), PACK)
    e_pad = et_p.shape[0]
    e4 = e_pad // PACK
    e_out = edge_embed(
        et_p.reshape(e4, -1), es_p.reshape(e4, -1),
        eb_p.reshape(e4, -1), ed_p.reshape(e4, -1),
        prepared["w_et4"], prepared["w_es4"], prepared["w_eb4"],
        prepared["w_ef4"], prepared["b_e4"],
        prepared["ef_mu"], prepared["ef_dev"],
        block_rows=block_rows).reshape(e_pad, H)
    if e_pad != ne:
        e_out = e_out[:ne]
    return h_out, e_out, sign.reshape(1, -1)


# ----------------------------- reference -------------------------------------
def reference_forward(params, h, lap_pos_enc, et, es, ed, eb, sign):
    def lin(p, x):
        w, b = p
        return x @ w.T + b
    h1 = lin(params["linear_h"], h) + lin(params["embedding_lap_pos_enc"],
                                          lap_pos_enc * sign)
    ef = jnp.exp(-((ed - params["ef_mu"]) ** 2) / params["ef_dev"])
    ec = lin(params["linear_ec"], jnp.concatenate([et, es, eb], axis=-1))
    eff = lin(params["linear_ef"], ef)
    e = lin(params["linear_e"], jnp.concatenate([ec, eff], axis=-1))
    return h1, e


if __name__ == "__main__":
    # small shapes; row counts deliberately NOT multiples of 4/8 to exercise the
    # pad-to-4 packing and Pallas ragged-last-block masking
    N, E = 10, 37
    in_dim_node, pos_enc_dim, hidden_dim = 4, 8, 32
    d_type, d_same, d_bond = 5, 1, 3
    in_dim_edge = d_type + d_same + d_bond

    key = jax.random.PRNGKey(0)
    kp, kh, kl, kt, ks_, kd, kb, ksign = jax.random.split(key, 8)

    params = init_params(kp, in_dim_node, in_dim_edge, hidden_dim, pos_enc_dim,
                         initial_mu=4.0, initial_dev=1.0)
    prepared = prepare_params(params, (d_type, d_same, d_bond))

    h = jax.random.normal(kh, (N, in_dim_node), jnp.float32)
    lap = jax.random.normal(kl, (N, pos_enc_dim), jnp.float32)
    et = jax.random.normal(kt, (E, d_type), jnp.float32)
    es = jax.random.normal(ks_, (E, d_same), jnp.float32)
    ed = jax.random.uniform(kd, (E, 1), jnp.float32, 0.0, 8.0)
    eb = jax.random.normal(kb, (E, d_bond), jnp.float32)

    h_out, e_out, sign = input_embedding_forward(prepared, h, lap, et, es, ed,
                                                 eb, ksign)
    h_out, e_out = jax.block_until_ready((h_out, e_out))

    h_ref, e_ref = reference_forward(params, h, lap, et, es, ed, eb, sign)
    assert h_out.shape == (N, hidden_dim) and e_out.shape == (E, hidden_dim)
    assert jnp.allclose(h_out, h_ref, atol=1e-4, rtol=1e-4), "node embedding mismatch"
    assert jnp.allclose(e_out, e_ref, atol=1e-4, rtol=1e-4), "edge embedding mismatch"

    print("KERNEL_OK")
</pallas_src>

<mosaic_0001>
module attributes {stable_mosaic.version = 11 : i64} {
  func.func @_node_kernel(%arg0: i32, %arg1: memref<3x16xf32, #tpu.memory_space<vmem>>, %arg2: memref<3x32xf32, #tpu.memory_space<vmem>>, %arg3: memref<16x128xf32, #tpu.memory_space<vmem>>, %arg4: memref<32x128xf32, #tpu.memory_space<vmem>>, %arg5: memref<1x128xf32, #tpu.memory_space<vmem>>, %arg6: memref<3x128xf32, #tpu.memory_space<vmem>>) attributes {dimension_semantics = [#tpu.dimension_semantics<parallel>], iteration_bounds = array<i64: 1>, scalar_prefetch = 0 : i64, scratch_operands = 0 : i64, tpu.core_type = #tpu.core_type<tc>, window_params = [{transform_indices = @transform_0, window_bounds = array<i64: 3, 16>}, {transform_indices = @transform_1, window_bounds = array<i64: 3, 32>}, {pipeline_mode = #tpu.pipeline_mode<synchronous>, transform_indices = @transform_2, window_bounds = array<i64: 16, 128>}, {pipeline_mode = #tpu.pipeline_mode<synchronous>, transform_indices = @transform_3, window_bounds = array<i64: 32, 128>}, {pipeline_mode = #tpu.pipeline_mode<synchronous>, transform_indices = @transform_4, window_bounds = array<i64: 1, 128>}, {transform_indices = @transform_5, window_bounds = array<i64: 3, 128>}]} {
    %c0 = arith.constant 0 : index
    %c0_0 = arith.constant 0 : index
    %0 = vector.load %arg1[%c0, %c0_0] : memref<3x16xf32, #tpu.memory_space<vmem>>, vector<3x16xf32>
    %c0_1 = arith.constant 0 : index
    %c0_2 = arith.constant 0 : index
    %1 = vector.load %arg3[%c0_1, %c0_2] : memref<16x128xf32, #tpu.memory_space<vmem>>, vector<16x128xf32>
    %cst = arith.constant dense<0.000000e+00> : vector<3x128xf32>
    %2 = tpu.matmul %0, %1, %cst {dimension_numbers = #tpu.dot_dimension_numbers<[1], [0], [0], [1], [0, 0, 1, 1], [], []>} : vector<3x16xf32>, vector<16x128xf32>, vector<3x128xf32> -> vector<3x128xf32>
    %c0_3 = arith.constant 0 : index
    %c0_4 = arith.constant 0 : index
    %3 = vector.load %arg2[%c0_3, %c0_4] : memref<3x32xf32, #tpu.memory_space<vmem>>, vector<3x32xf32>
    %c0_5 = arith.constant 0 : index
    %c0_6 = arith.constant 0 : index
    %4 = vector.load %arg4[%c0_5, %c0_6] : memref<32x128xf32, #tpu.memory_space<vmem>>, vector<32x128xf32>
    %cst_7 = arith.constant dense<0.000000e+00> : vector<3x128xf32>
    %5 = tpu.matmul %3, %4, %cst_7 {dimension_numbers = #tpu.dot_dimension_numbers<[1], [0], [0], [1], [0, 0, 1, 1], [], []>} : vector<3x32xf32>, vector<32x128xf32>, vector<3x128xf32> -> vector<3x128xf32>
    %6 = arith.addf %2, %5 : vector<3x128xf32>
    %c0_8 = arith.constant 0 : index
    %c0_9 = arith.constant 0 : index
    %7 = vector.load %arg5[%c0_8, %c0_9] : memref<1x128xf32, #tpu.memory_space<vmem>>, vector<1x128xf32>
    %8 = vector.broadcast %7 : vector<1x128xf32> to vector<3x128xf32>
    %9 = arith.addf %6, %8 : vector<3x128xf32>
    %c0_10 = arith.constant 0 : index
    %c0_11 = arith.constant 0 : index
    %10 = vector.load %arg6[%c0_10, %c0_11] : memref<3x128xf32, #tpu.memory_space<vmem>>, vector<3x128xf32>
    tpu.vector_store %arg6[%c0_10, %c0_11], %9 {strides = array<i32>} : memref<3x128xf32, #tpu.memory_space<vmem>>, vector<3x128xf32>,
    return
  }
  func.func @transform_0(%arg0: i32) -> (i32, i32) {
    %c0_i32 = arith.constant 0 : i32
    %c0_i32_0 = arith.constant 0 : i32
    return %arg0, %c0_i32 : i32, i32
  }
  func.func @transform_1(%arg0: i32) -> (i32, i32) {
    %c0_i32 = arith.constant 0 : i32
    %c0_i32_0 = arith.constant 0 : i32
    return %arg0, %c0_i32 : i32, i32
  }
  func.func @transform_2(%arg0: i32) -> (i32, i32) {
    %c0_i32 = arith.constant 0 : i32
    %c0_i32_0 = arith.constant 0 : i32
    %c0_i32_1 = arith.constant 0 : i32
    return %c0_i32, %c0_i32_0 : i32, i32
  }
  func.func @transform_3(%arg0: i32) -> (i32, i32) {
    %c0_i32 = arith.constant 0 : i32
    %c0_i32_0 = arith.constant 0 : i32
    %c0_i32_1 = arith.constant 0 : i32
    return %c0_i32, %c0_i32_0 : i32, i32
  }
  func.func @transform_4(%arg0: i32) -> (i32, i32) {
    %c0_i32 = arith.constant 0 : i32
    %c0_i32_0 = arith.constant 0 : i32
    %c0_i32_1 = arith.constant 0 : i32
    return %c0_i32, %c0_i32_0 : i32, i32
  }
  func.func @transform_5(%arg0: i32) -> (i32, i32) {
    %c0_i32 = arith.constant 0 : i32
    %c0_i32_0 = arith.constant 0 : i32
    return %arg0, %c0_i32 : i32, i32
  }
}

</mosaic_0001>

<bundles_post_ra>
// kernel: tpu_custom_call.1
= control target key start
LH: loop header
LB: loop body
LE: loop exit
PB: predicated region body
PF: predicated region fallthrough
CT: control target
= control target key end

     0   :  { %10 = vsyncpa [#allocation3], 0  ;;  %s354_s0 = inlined_call_operand.hbm [shape: f32[3,16], index: 0, kind: input, shape index: {}]   ;;  %s355_s1 = inlined_call_operand.hbm [shape: f32[3,32], index: 1, kind: input, shape index: {}]   ;;  %s356_s2 = inlined_call_operand.hbm [shape: f32[16,128], index: 2, kind: input, shape index: {}]   ;;  %s357_s3 = inlined_call_operand.hbm [shape: f32[32,128], index: 3, kind: input, shape index: {}]   ;;  %s358_s4 = inlined_call_operand.vmem [shape: f32[1,128], index: 4, kind: input, shape index: {}]   ;;  %s359_s5 = inlined_call_operand.hbm [shape: f32[3,128], index: 5, kind: output, shape index: {}]  }
   0x1   :  { %11 = vsyncpa [#allocation6], 0 }
   0x2   :  { %12 = vsyncpa [#allocation9], 0  ;;  %s30_s20 = sshll.u32 %s355_s1, 4  ;;  %s31_s20 = int_to_ptr.hbm [resolvable:$true] %s30_s20 }
   0x3   :  { %13 = vsyncpa [#allocation4], 0  ;;  %s299_s21 = smov [#allocation5]   ;;  %s19_s25 = sshll.u32 %s354_s0, 4  ;;  %s20_s25 = int_to_ptr.hbm [resolvable:$true] %s19_s25 }
   0x4   :  { %s32_s22 = sshll.u32 %s299_s21, 4  ;;  %s300_s26 = smov [#allocation2]   ;;  %s33_s22 = int_to_ptr.vmem [resolvable:$true] %s32_s22 }
   0x5   :  { %35 = dma.hbm_to_vmem [thread:$0]  %s31_s20, 64, %s33_s22, [#allocation6]  }
   0x6   :  { %s21_s27 = sshll.u32 %s300_s26, 4  ;;  %s40_s30 = sshll.u32 %s356_s2, 4  ;;  %s22_s27 = int_to_ptr.vmem [resolvable:$true] %s21_s27  ;;  %s41_s30 = int_to_ptr.hbm [resolvable:$true] %s40_s30 }
   0x7   :  { %24 = dma.hbm_to_vmem [thread:$0]  %s20_s25, 64, %s22_s27, [#allocation3]  }
   0x8   :  { %s301_s1 = smov [#allocation7]   ;;  %s53_s9 = sshll.u32 %s357_s3, 4  ;;  %s54_s9 = int_to_ptr.hbm [resolvable:$true] %s53_s9 }
   0x9   :  { %s42_s6 = sshll.u32 %s301_s1, 4  ;;  %s302_s10 = smov 128   ;;  %s43_s6 = int_to_ptr.vmem [resolvable:$true] %s42_s6 }
   0xa   :  { %s303_s0 = smov 8   ;;  %s304_s11 = smov [#allocation8]  }
   0xb   :  { %48 = dma.hbm_to_vmem [thread:$0]  %s41_s30, 256, %s43_s6, [#allocation6], %s302_s10, %s302_s10, %s303_s0  }
   0xc   :  { %s55_s12 = sshll.u32 %s304_s11, 4  ;;  %s56_s12 = int_to_ptr.vmem [resolvable:$true] %s55_s12 }
   0xd   :  { %61 = dma.hbm_to_vmem [thread:$0]  %s54_s9, 512, %s56_s12, [#allocation9], %s302_s10, %s302_s10, %s303_s0  }
   0xe   :  { %291 = dma.done.wait [#allocation3], 64  }
   0xf   :  { %292 = vsyncadd [#allocation3], 4294967232 }
  0x10   :  { %293 = dma.done.wait [#allocation6], 320  }
  0x11   :  { %294 = vsyncadd [#allocation6], 4294966976 }
  0x12   :  { %295 = dma.done.wait [#allocation9], 512  }
  0x13   :  { %296 = vsyncadd [#allocation9], 4294966784  ;;  %v87_v0 = vld [vmem:[#allocation8 + $0x18] sm:$0xff]  ;;  %v86_v1 = vld [vmem:[#allocation8 + $0x10] sm:$0xff]  ;;  %vm112_vm0 = vcmask 130048   ;;  %vm88_vm1 = vcmask 261120  }
  0x14   :  { %104 = vmatpush.msra.mxu0 %v87_v0  ;;  %v82_v2 = vld [vmem:[#allocation7 + $0x8] sm:$0xff]  ;;  %v81_v3 = vld [vmem:[#allocation7] sm:$0xff]  ;;  %v85_v4 = vld [vmem:[#allocation8 + $0x8] sm:$0xff]  ;;  %s305_s13 = smov [#allocation10]   ;;  %s149_s17 = sshll.u32 %s359_s5, 4  ;;  %s150_s17 = int_to_ptr.hbm [resolvable:$true] %s149_s17 }
  0x15   :  { %130 = vmatpush.msra.mxu1 %v82_v2  ;;  %v80_v5 = vld [vmem:[#allocation2] sm:$0x7]  ;;  %v84_v6 = vld [vmem:[#allocation8] sm:$0xff]  ;;  %v83_v7 = vld [vmem:[#allocation5] sm:$0x7]  ;;  %s147_s14 = sshll.u32 %s305_s13, 4  ;;  %s148_s14 = int_to_ptr.vmem [resolvable:$true] %s147_s14 }
  0x16   :  { %105 = vmatpush.msra.mxu0 %v86_v1  ;;  %v170_v9 = vld [vmem:[%s358_s4] ss:$0 sm:$0xff] }
  0x17   :  { %131 = vmatpush.msra.mxu1 %v81_v3 }
  0x18   :  { %106 = vmatpush.msra.mxu0 %v85_v4  ;;  %162 = vmatmul.msk.f32.vlgmr.msra.gmra.mxu1 %vm112_vm0, %v80_v5 }
  0x1a   :  { %107 = vmatpush.msra.mxu0 %v84_v6 }
  0x1b   :  { %161 = vmatmul.msk.f32.vlgmr.msra.gmra.mxu0 %vm88_vm1, %v83_v7 }
  0x95   :  { %v133_v8 = vpop.f32.mrf.mxu1 }
  0x98   :  { %v109_v10 = vpop.f32.mrf.mxu0 }
  0x99   :  { %v134_v11 = vadd.f32 %v133_v8, %v109_v10 }
  0x9b   :  { %v140_v12 = vadd.f32 %v170_v9, %v134_v11 }
  0x9d   :  { %141 = vst [vmem:[#allocation10] sm:$0x7] %v140_v12 }
  0x9e   :  { %152 = dma.vmem_to_hbm [thread:$0]  %s148_s14, 64, %s150_s17, [#allocation4]  }
  0x9f   :  { %297 = dma.done.wait [#allocation4], 64  }
  0xa0   :  { %298 = vsyncadd [#allocation4], 4294967232 }
  0xa1   :  { %157 = vsyncpa [#allocation3], 1 }
  0xa2   :  { %158 = vsyncpa [#allocation6], 1 }
  0xa3   :  { %159 = vsyncpa [#allocation9], 1 }
  0xa4   :  { %160 = vsyncpa [#allocation4], 1 }

</bundles_post_ra>
